<compile_context>
chip_gen: v5e
topology: v5e:2x2
jax: 0.10.0
libtpu: 0.0.40
codegen_flags: <defaults>
</compile_context>

<pallas_src>
import numpy as np
import jax
import jax.numpy as jnp
from jax.experimental import pallas as pl
from jax.experimental.pallas import tpu as pltpu

N_QUBITS = 2
DEPTH = 2
X_MIN, X_MAX = 0.0, 10.0
INPUT_SCALE = 2.0 / (X_MAX - X_MIN)
# half-angle affine map: h = 0.5 * ((x - x_min)*input_scale - 1) = SLOPE*x + OFFSET
SLOPE = 0.5 * INPUT_SCALE
OFFSET = 0.5 * (-X_MIN * INPUT_SCALE - 1.0)

LANES = 128
MAX_BLOCK_ROWS = 2048   # (2048,128) f32 = 1 MiB; in+out double-buffered ~4 MiB (fits all gens)

_PI = float(np.pi)
_INV_PI = float(1.0 / np.pi)

_CNOT_NP = np.array([[1, 0, 0, 0],
                     [0, 1, 0, 0],
                     [0, 0, 0, 1],
                     [0, 0, 1, 0]], dtype=np.complex64)


# ----------------------------- Pallas kernel ---------------------------------

def qnn_kernel(coef_ref, x_ref, o_ref):
    """coef_ref: (16,) f32 in SMEM [C0,C1,C2,C3,S1,S2,S3,slope,offset,...pad];
    x_ref / o_ref: (block_rows, 128) f32 in VMEM (lane-dense batch)."""
    x = x_ref[...]

    # Half-angle with the affine input rescale folded in: h = slope*x + offset.
    h = coef_ref[7] * x + coef_ref[8]

    # Reduce h modulo pi to [-pi/2, pi/2].  The (-1)^k sign flips on sin/cos of
    # the half-angle cancel exactly in the double-angle identities below, so the
    # result is correct for ANY real x (no input-domain contract needed).
    k = jnp.floor(h * _INV_PI + 0.5)
    hr = h - k * _PI
    z = hr * hr

    # Short Horner polynomials (Taylor deg 9 / 10) on |hr| <= pi/2:
    # max abs error ~4e-6; pure VPU FMAs, no transcendental unit.
    sh = hr * (1.0 + z * (-1.0 / 6.0 + z * (1.0 / 120.0
               + z * (-1.0 / 5040.0 + z * (1.0 / 362880.0)))))
    ch = 1.0 + z * (-0.5 + z * (1.0 / 24.0 + z * (-1.0 / 720.0
               + z * (1.0 / 40320.0 + z * (-1.0 / 3628800.0)))))

    # Harmonics of theta = 2*h via double-angle + Chebyshev recurrence.
    c1 = 1.0 - 2.0 * (sh * sh)      # cos(theta)
    s1 = 2.0 * sh * ch              # sin(theta)
    tc = c1 + c1
    c2 = tc * c1 - 1.0              # cos(2 theta)
    s2 = tc * s1                    # sin(2 theta)
    c3 = tc * c2 - c1               # cos(3 theta)
    s3 = tc * s2 - s1               # sin(3 theta)

    o_ref[...] = (coef_ref[0]
                  + coef_ref[1] * c1 + coef_ref[2] * c2 + coef_ref[3] * c3
                  + coef_ref[4] * s1 + coef_ref[5] * s2 + coef_ref[6] * s3)


# ----------------------------- JAX-side parameter folding --------------------

def _rx_jax(t):
    c = jnp.cos(0.5 * t).astype(jnp.complex64)
    ms = ((-1j) * jnp.sin(0.5 * t)).astype(jnp.complex64)
    return jnp.stack([jnp.stack([c, ms]), jnp.stack([ms, c])])


def _ry_jax(t):
    c = jnp.cos(0.5 * t)
    s = jnp.sin(0.5 * t)
    return jnp.stack([jnp.stack([c, -s]), jnp.stack([s, c])]).astype(jnp.complex64)


def _ansatz_unitary_jax(theta):
    """hea(n_qubits=2, depth=2): per layer [RX, RY, RX] on each qubit, then CNOT(0,1)."""
    theta = theta.astype(jnp.float32)
    cnot = jnp.asarray(_CNOT_NP)
    A = jnp.eye(4, dtype=jnp.complex64)
    for d in range(DEPTH):
        rx_a = jnp.kron(_rx_jax(theta[d, 0, 0]), _rx_jax(theta[d, 0, 1]))
        ry_l = jnp.kron(_ry_jax(theta[d, 1, 0]), _ry_jax(theta[d, 1, 1]))
        rx_b = jnp.kron(_rx_jax(theta[d, 2, 0]), _rx_jax(theta[d, 2, 1]))
        A = cnot @ rx_b @ ry_l @ rx_a @ A
    return A


def _fold_coeffs(theta, output_scale):
    """Fold (theta, output_scale, observable) into the degree-3 Fourier series
    y = C0 + sum_k Ck cos(k*x_s) + Sk sin(k*x_s).

    The expectation is an exact trig polynomial of degree <= 3, so a 7-point DFT
    of exact statevector evaluations recovers the coefficients exactly.  All-jnp
    so it lives inside the jit (no host fold, no kernel retrace when theta or
    output_scale change).
    """
    A = _ansatz_unitary_jax(theta)
    th = (2.0 * jnp.pi / 7.0) * jnp.arange(7, dtype=jnp.float32)   # sample angles
    ch, sh = jnp.cos(0.5 * th), jnp.sin(0.5 * th)
    c, s = jnp.cos(th), jnp.sin(th)
    # FM(th)|00>, index = 2*q0 + q1 (q0 scale 1, q1 scale 2)  -> (4, 7) complex
    states = jnp.stack([
        (ch * c).astype(jnp.complex64),
        ((-1j) * (ch * s)).astype(jnp.complex64),
        ((-1j) * (sh * c)).astype(jnp.complex64),
        (-(sh * s)).astype(jnp.complex64),
    ])
    psi = A @ states
    prob = jnp.real(psi) ** 2 + jnp.imag(psi) ** 2
    e = jnp.asarray(output_scale, dtype=jnp.float32) * 2.0 * (prob[0] - prob[3])  # <Z0+Z1>
    kf = jnp.arange(1, 4, dtype=jnp.float32)
    ck = (2.0 / 7.0) * (jnp.cos(jnp.outer(kf, th)) @ e)
    sk = (2.0 / 7.0) * (jnp.sin(jnp.outer(kf, th)) @ e)
    c0 = jnp.mean(e)
    return jnp.concatenate([
        c0[None], ck, sk,
        jnp.array([SLOPE, OFFSET], dtype=jnp.float32),
        jnp.zeros(7, dtype=jnp.float32),
    ]).astype(jnp.float32)                                        # (16,)


# ----------------------------- forward ----------------------------------------

@jax.jit
def scaled_model_forward(x, theta, output_scale):
    # TODO(synk): gradients w.r.t. x/coeffs through pallas_call would need a custom_vjp.
    B = x.shape[0]
    coef = _fold_coeffs(theta, output_scale)

    x_flat = x.astype(jnp.float32).reshape(-1)
    if B % LANES == 0:
        rows = B // LANES                                  # free reshape, no pad pass
        x2d = x_flat.reshape(rows, LANES)
    else:
        rows = 8 * pl.cdiv(pl.cdiv(B, LANES), 8)           # pad only to next 8x128 tile
        x2d = jnp.pad(x_flat, (0, rows * LANES - B)).reshape(rows, LANES)

    if rows <= 8:
        block_rows = rows                                  # single full-array block
    else:
        # >= 2 blocks so ("parallel",) actually shards across both v7x TensorCores.
        half = 8 * pl.cdiv(pl.cdiv(rows, 2), 8)
        block_rows = min(MAX_BLOCK_ROWS, half)
    grid = (pl.cdiv(rows, block_rows),)                    # ragged last block is masked

    n = rows * LANES
    out2d = pl.pallas_call(
        qnn_kernel,
        out_shape=jax.ShapeDtypeStruct((rows, LANES), jnp.float32),
        grid=grid,
        in_specs=[
            pl.BlockSpec(memory_space=pltpu.MemorySpace.SMEM),       # (16,) coefficients
            pl.BlockSpec((block_rows, LANES), lambda i: (i, 0)),
        ],
        out_specs=pl.BlockSpec((block_rows, LANES), lambda i: (i, 0)),
        compiler_params=pltpu.CompilerParams(
            dimension_semantics=("parallel",)),
        cost_estimate=pl.CostEstimate(
            flops=40 * n, transcendentals=0, bytes_accessed=8 * n + 64),
    )(coef, x2d)

    return out2d.reshape(-1)[:B].reshape(B, 1)


# ----------------------------- pure-numpy reference (float64 statevector) -----

def _np_rx(t):
    c, s = np.cos(t / 2.0), np.sin(t / 2.0)
    return np.array([[c, -1j * s], [-1j * s, c]], dtype=np.complex128)


def _np_ry(t):
    c, s = np.cos(t / 2.0), np.sin(t / 2.0)
    return np.array([[c, -s], [s, c]], dtype=np.complex128)


def _np_ansatz(theta):
    th = np.asarray(theta, dtype=np.float64)
    cnot = _CNOT_NP.astype(np.complex128)
    A = np.eye(4, dtype=np.complex128)
    for d in range(DEPTH):
        rx_a = np.kron(_np_rx(th[d, 0, 0]), _np_rx(th[d, 0, 1]))
        ry_l = np.kron(_np_ry(th[d, 1, 0]), _np_ry(th[d, 1, 1]))
        rx_b = np.kron(_np_rx(th[d, 2, 0]), _np_rx(th[d, 2, 1]))
        A = (cnot @ rx_b @ ry_l @ rx_a) @ A
    return A


def reference(x, theta, output_scale):
    A = _np_ansatz(theta)
    obs = np.diag([2.0, 0.0, 0.0, -2.0]).astype(np.complex128)
    e0 = np.array([1, 0, 0, 0], dtype=np.complex128)
    outs = []
    for xi in np.asarray(x)[:, 0]:
        xs = (float(xi) - X_MIN) * INPUT_SCALE - 1.0
        fm = np.kron(_np_rx(xs), _np_rx(2.0 * xs))          # index = 2*q0 + q1
        psi = A @ (fm @ e0)
        outs.append(float(output_scale) * float(np.real(np.conj(psi) @ obs @ psi)))
    return np.array(outs, dtype=np.float32)[:, None]


# ----------------------------- main -------------------------------------------

if __name__ == "__main__":
    key = jax.random.PRNGKey(0)
    k_theta, k_x1, k_x2 = jax.random.split(key, 3)

    # hea(n_qubits=2, depth=2) variational params: (depth, 3 rotation layers, n_qubits)
    theta = jax.random.uniform(k_theta, (DEPTH, 3, N_QUBITS),
                               minval=0.0, maxval=2.0 * np.pi, dtype=jnp.float32)
    output_scale = jnp.float32(1.0)   # torch.nn.Parameter(torch.tensor(1.0))

    # Small demo batch (pad path, single block).
    B = 16
    x = jax.random.uniform(k_x1, (B, 1), minval=X_MIN, maxval=X_MAX, dtype=jnp.float32)
    out = jax.block_until_ready(scaled_model_forward(x, theta, output_scale))
    np.testing.assert_allclose(np.asarray(out), reference(x, theta, output_scale),
                               rtol=1e-3, atol=1e-3)

    # Pad-free multi-block path (exercises 2-block "parallel" grid + ragged last block).
    B2 = 1536
    x2 = jax.random.uniform(k_x2, (B2, 1), minval=X_MIN, maxval=X_MAX, dtype=jnp.float32)
    out2 = jax.block_until_ready(scaled_model_forward(x2, theta, output_scale))
    np.testing.assert_allclose(np.asarray(out2), reference(x2, theta, output_scale),
                               rtol=1e-3, atol=1e-3)

    print("KERNEL_OK")
</pallas_src>

<mosaic_0001>
module attributes {stable_mosaic.version = 11 : i64} {
  func.func @qnn_kernel(%arg0: i32, %arg1: memref<16xf32, #tpu.memory_space<smem>>, %arg2: memref<8x128xf32, #tpu.memory_space<vmem>>, %arg3: memref<8x128xf32, #tpu.memory_space<vmem>>) attributes {dimension_semantics = [#tpu.dimension_semantics<parallel>], iteration_bounds = array<i64: 1>, scalar_prefetch = 0 : i64, scratch_operands = 0 : i64, tpu.core_type = #tpu.core_type<tc>, window_params = [{transform_indices = @transform_0, window_bounds = array<i64: 16>}, {transform_indices = @transform_1, window_bounds = array<i64: 8, 128>}, {transform_indices = @transform_2, window_bounds = array<i64: 8, 128>}]} {
    %c0 = arith.constant 0 : index
    %c0_0 = arith.constant 0 : index
    %0 = vector.load %arg2[%c0, %c0_0] : memref<8x128xf32, #tpu.memory_space<vmem>>, vector<8x128xf32>
    %c7 = arith.constant 7 : index
    %1 = memref.load %arg1[%c7] : memref<16xf32, #tpu.memory_space<smem>>
    %2 = vector.broadcast %1 : f32 to vector<8x128xf32>
    %3 = arith.mulf %2, %0 : vector<8x128xf32>
    %c8 = arith.constant 8 : index
    %4 = memref.load %arg1[%c8] : memref<16xf32, #tpu.memory_space<smem>>
    %5 = vector.broadcast %4 : f32 to vector<8x128xf32>
    %6 = arith.addf %3, %5 : vector<8x128xf32>
    %cst = arith.constant 0.318309873 : f32
    %7 = vector.broadcast %cst : f32 to vector<8x128xf32>
    %8 = arith.mulf %6, %7 : vector<8x128xf32>
    %cst_1 = arith.constant 5.000000e-01 : f32
    %9 = vector.broadcast %cst_1 : f32 to vector<8x128xf32>
    %10 = arith.addf %8, %9 : vector<8x128xf32>
    %11 = math.floor %10 : vector<8x128xf32>
    %cst_2 = arith.constant 3.14159274 : f32
    %12 = vector.broadcast %cst_2 : f32 to vector<8x128xf32>
    %13 = arith.mulf %11, %12 : vector<8x128xf32>
    %14 = arith.subf %6, %13 : vector<8x128xf32>
    %15 = arith.mulf %14, %14 : vector<8x128xf32>
    %cst_3 = arith.constant 2.75573188E-6 : f32
    %16 = vector.broadcast %cst_3 : f32 to vector<8x128xf32>
    %17 = arith.mulf %15, %16 : vector<8x128xf32>
    %cst_4 = arith.constant -1.98412701E-4 : f32
    %18 = vector.broadcast %cst_4 : f32 to vector<8x128xf32>
    %19 = arith.addf %18, %17 : vector<8x128xf32>
    %20 = arith.mulf %15, %19 : vector<8x128xf32>
    %cst_5 = arith.constant 0.00833333377 : f32
    %21 = vector.broadcast %cst_5 : f32 to vector<8x128xf32>
    %22 = arith.addf %21, %20 : vector<8x128xf32>
    %23 = arith.mulf %15, %22 : vector<8x128xf32>
    %cst_6 = arith.constant -0.166666672 : f32
    %24 = vector.broadcast %cst_6 : f32 to vector<8x128xf32>
    %25 = arith.addf %24, %23 : vector<8x128xf32>
    %26 = arith.mulf %15, %25 : vector<8x128xf32>
    %cst_7 = arith.constant 1.000000e+00 : f32
    %27 = vector.broadcast %cst_7 : f32 to vector<8x128xf32>
    %28 = arith.addf %27, %26 : vector<8x128xf32>
    %29 = arith.mulf %14, %28 : vector<8x128xf32>
    %cst_8 = arith.constant -2.755732E-7 : f32
    %30 = vector.broadcast %cst_8 : f32 to vector<8x128xf32>
    %31 = arith.mulf %15, %30 : vector<8x128xf32>
    %cst_9 = arith.constant 2.48015876E-5 : f32
    %32 = vector.broadcast %cst_9 : f32 to vector<8x128xf32>
    %33 = arith.addf %32, %31 : vector<8x128xf32>
    %34 = arith.mulf %15, %33 : vector<8x128xf32>
    %cst_10 = arith.constant -0.00138888892 : f32
    %35 = vector.broadcast %cst_10 : f32 to vector<8x128xf32>
    %36 = arith.addf %35, %34 : vector<8x128xf32>
    %37 = arith.mulf %15, %36 : vector<8x128xf32>
    %cst_11 = arith.constant 0.0416666679 : f32
    %38 = vector.broadcast %cst_11 : f32 to vector<8x128xf32>
    %39 = arith.addf %38, %37 : vector<8x128xf32>
    %40 = arith.mulf %15, %39 : vector<8x128xf32>
    %cst_12 = arith.constant -5.000000e-01 : f32
    %41 = vector.broadcast %cst_12 : f32 to vector<8x128xf32>
    %42 = arith.addf %41, %40 : vector<8x128xf32>
    %43 = arith.mulf %15, %42 : vector<8x128xf32>
    %cst_13 = arith.constant 1.000000e+00 : f32
    %44 = vector.broadcast %cst_13 : f32 to vector<8x128xf32>
    %45 = arith.addf %44, %43 : vector<8x128xf32>
    %46 = arith.mulf %29, %29 : vector<8x128xf32>
    %cst_14 = arith.constant 2.000000e+00 : f32
    %47 = vector.broadcast %cst_14 : f32 to vector<8x128xf32>
    %48 = arith.mulf %47, %46 : vector<8x128xf32>
    %cst_15 = arith.constant 1.000000e+00 : f32
    %49 = vector.broadcast %cst_15 : f32 to vector<8x128xf32>
    %50 = arith.subf %49, %48 : vector<8x128xf32>
    %cst_16 = arith.constant 2.000000e+00 : f32
    %51 = vector.broadcast %cst_16 : f32 to vector<8x128xf32>
    %52 = arith.mulf %51, %29 : vector<8x128xf32>
    %53 = arith.mulf %52, %45 : vector<8x128xf32>
    %54 = arith.addf %50, %50 : vector<8x128xf32>
    %55 = arith.mulf %54, %50 : vector<8x128xf32>
    %cst_17 = arith.constant 1.000000e+00 : f32
    %56 = vector.broadcast %cst_17 : f32 to vector<8x128xf32>
    %57 = arith.subf %55, %56 : vector<8x128xf32>
    %58 = arith.mulf %54, %53 : vector<8x128xf32>
    %59 = arith.mulf %54, %57 : vector<8x128xf32>
    %60 = arith.subf %59, %50 : vector<8x128xf32>
    %61 = arith.mulf %54, %58 : vector<8x128xf32>
    %62 = arith.subf %61, %53 : vector<8x128xf32>
    %c0_18 = arith.constant 0 : index
    %63 = memref.load %arg1[%c0_18] : memref<16xf32, #tpu.memory_space<smem>>
    %c1 = arith.constant 1 : index
    %64 = memref.load %arg1[%c1] : memref<16xf32, #tpu.memory_space<smem>>
    %65 = vector.broadcast %64 : f32 to vector<8x128xf32>
    %66 = arith.mulf %65, %50 : vector<8x128xf32>
    %67 = vector.broadcast %63 : f32 to vector<8x128xf32>
    %68 = arith.addf %67, %66 : vector<8x128xf32>
    %c2 = arith.constant 2 : index
    %69 = memref.load %arg1[%c2] : memref<16xf32, #tpu.memory_space<smem>>
    %70 = vector.broadcast %69 : f32 to vector<8x128xf32>
    %71 = arith.mulf %70, %57 : vector<8x128xf32>
    %72 = arith.addf %68, %71 : vector<8x128xf32>
    %c3 = arith.constant 3 : index
    %73 = memref.load %arg1[%c3] : memref<16xf32, #tpu.memory_space<smem>>
    %74 = vector.broadcast %73 : f32 to vector<8x128xf32>
    %75 = arith.mulf %74, %60 : vector<8x128xf32>
    %76 = arith.addf %72, %75 : vector<8x128xf32>
    %c4 = arith.constant 4 : index
    %77 = memref.load %arg1[%c4] : memref<16xf32, #tpu.memory_space<smem>>
    %78 = vector.broadcast %77 : f32 to vector<8x128xf32>
    %79 = arith.mulf %78, %53 : vector<8x128xf32>
    %80 = arith.addf %76, %79 : vector<8x128xf32>
    %c5 = arith.constant 5 : index
    %81 = memref.load %arg1[%c5] : memref<16xf32, #tpu.memory_space<smem>>
    %82 = vector.broadcast %81 : f32 to vector<8x128xf32>
    %83 = arith.mulf %82, %58 : vector<8x128xf32>
    %84 = arith.addf %80, %83 : vector<8x128xf32>
    %c6 = arith.constant 6 : index
    %85 = memref.load %arg1[%c6] : memref<16xf32, #tpu.memory_space<smem>>
    %86 = vector.broadcast %85 : f32 to vector<8x128xf32>
    %87 = arith.mulf %86, %62 : vector<8x128xf32>
    %88 = arith.addf %84, %87 : vector<8x128xf32>
    %c0_19 = arith.constant 0 : index
    %c0_20 = arith.constant 0 : index
    %89 = vector.load %arg3[%c0_19, %c0_20] : memref<8x128xf32, #tpu.memory_space<vmem>>, vector<8x128xf32>
    tpu.vector_store %arg3[%c0_19, %c0_20], %88 {strides = array<i32>} : memref<8x128xf32, #tpu.memory_space<vmem>>, vector<8x128xf32>,
    return
  }
  func.func @transform_0(%arg0: i32) -> i32 {
    %c0_i32 = arith.constant 0 : i32
    %c0_i32_0 = arith.constant 0 : i32
    return %c0_i32 : i32
  }
  func.func @transform_1(%arg0: i32) -> (i32, i32) {
    %c0_i32 = arith.constant 0 : i32
    %c0_i32_0 = arith.constant 0 : i32
    return %arg0, %c0_i32 : i32, i32
  }
  func.func @transform_2(%arg0: i32) -> (i32, i32) {
    %c0_i32 = arith.constant 0 : i32
    %c0_i32_0 = arith.constant 0 : i32
    return %arg0, %c0_i32 : i32, i32
  }
}

</mosaic_0001>

<bundles_post_ra>
// kernel: scaled_model_forward.1
= control target key start
LH: loop header
LB: loop body
LE: loop exit
PB: predicated region body
PF: predicated region fallthrough
CT: control target
= control target key end

     0   :  { %7 = vsyncpa [#allocation3], 0  ;;  %s125_s12 = smov [#allocation2]   ;;  %s150_s0 = inlined_call_operand.vmem [shape: f32[16], index: 0, kind: input, shape index: {}]   ;;  %s151_s1 = inlined_call_operand.vmem [shape: f32[8,128], index: 1, kind: input, shape index: {}]   ;;  %s152_s2 = inlined_call_operand.vmem [shape: f32[8,128], index: 2, kind: output, shape index: {}]  }
   0x1   :  { %s13_s11 = sshll.u32 %s150_s0, 4  ;;  %s14_s11 = int_to_ptr.vmem [resolvable:$true] %s13_s11 }
   0x2   :  { %16 = dma.vmem_to_smem %s14_s11, 16, %s125_s12, [#allocation3]  }
   0x3   :  { %123 = dma.done.wait [#allocation3], 16  }
   0x4   :  { %124 = vsyncadd [#allocation3], 4294967280 }
   0x5   :  { %23 = sfence }
   0x6   :  { %s101_s13 = sld [smem:[#allocation2 + $0x7]]  ;;  %v24_v0 = vld [vmem:[%s151_s1] sm:$0xff] }
   0x7   :  { %s102_s14 = sld [smem:[#allocation2 + $0x8]] }
   0x8   :  { %s104_s0 = sld [smem:[#allocation2 + $0x1]] }
   0x9   :  { %s69_s1 = sld [smem:[#allocation2]] }
   0xa   :  { %s105_s17 = sld [smem:[#allocation2 + $0x2]] }
   0xb   :  { %s106_s18 = sld [smem:[#allocation2 + $0x3]] }
   0xc   :  { %v26_v1 = vstv %s101_s13  ;;  %s107_s19 = sld [smem:[#allocation2 + $0x4]] }
   0xd   :  { %v27_v2 = vmul.f32 %v26_v1, %v24_v0  ;;  %v29_v3 = vstv %s102_s14  ;;  %s108_s20 = sld [smem:[#allocation2 + $0x5]] }
   0xe   :  { %v71_v33 = vstv %s104_s0  ;;  %s109_s21 = sld [smem:[#allocation2 + $0x6]] }
   0xf   :  { %v30_v4 = vadd.f32 %v29_v3, %v27_v2  ;;  %v73_v38 = vstv %s69_s1 }
  0x10   :  { %v76_v41 = vstv %s105_s17 }
  0x11   :  { %v31_v5 = vmul.f32 0.31830987, %v30_v4  ;;  %v80_v47 = vstv %s106_s18 }
  0x12   :  { %v84_v48 = vstv %s107_s19 }
  0x13   :  { %v32_v6 = vadd.f32 0.5, %v31_v5  ;;  %v88_v51 = vstv %s108_s20 }
  0x14   :  { %v92_v55 = vstv %s109_s21 }
  0x15   :  { %v33_v7 = vfloor.f32 %v32_v6 }
  0x17   :  { %v34_v8 = vmul.f32 3.1415927, %v33_v7 }
  0x19   :  { %v35_v9 = vsub.f32 %v30_v4, %v34_v8 }
  0x1b   :  { %v36_v10 = vmul.f32 %v35_v9, %v35_v9 }
  0x1d   :  { %v37_v11 = vmul.f32 2.7557319e-06, %v36_v10  ;;  %v46_v12 = vmul.f32 -2.755732e-07, %v36_v10 }
  0x1f   :  { %v38_v13 = vadd.f32 -0.0001984127, %v37_v11  ;;  %v47_v14 = vadd.f32 2.4801588e-05, %v46_v12 }
  0x21   :  { %v39_v15 = vmul.f32 %v38_v13, %v36_v10  ;;  %v48_v16 = vmul.f32 %v47_v14, %v36_v10 }
  0x23   :  { %v40_v17 = vadd.f32 0.008333334, %v39_v15  ;;  %v49_v18 = vadd.f32 -0.0013888889, %v48_v16 }
  0x25   :  { %v41_v19 = vmul.f32 %v40_v17, %v36_v10  ;;  %v50_v20 = vmul.f32 %v49_v18, %v36_v10 }
  0x27   :  { %v42_v21 = vadd.f32 -0.16666667, %v41_v19  ;;  %v51_v22 = vadd.f32 0.041666668, %v50_v20 }
  0x29   :  { %v43_v23 = vmul.f32 %v42_v21, %v36_v10  ;;  %v52_v24 = vmul.f32 %v51_v22, %v36_v10 }
  0x2b   :  { %v44_v25 = vadd.f32 1.0, %v43_v23  ;;  %v53_v26 = vadd.f32 -0.5, %v52_v24 }
  0x2d   :  { %v45_v27 = vmul.f32 %v44_v25, %v35_v9  ;;  %v54_v28 = vmul.f32 %v53_v26, %v36_v10 }
  0x2f   :  { %v55_v29 = vadd.f32 1.0, %v54_v28  ;;  %v56_v30 = vmul.f32 %v45_v27, %v45_v27  ;;  %v59_v31 = vmul.f32 2.0, %v45_v27 }
  0x31   :  { %v57_v32 = vmul.f32 2.0, %v56_v30  ;;  %v60_v35 = vmul.f32 %v59_v31, %v55_v29 }
  0x33   :  { %v58_v34 = vsub.f32 1.0, %v57_v32  ;;  %v85_v54 = vmul.f32 %v84_v48, %v60_v35 }
  0x35   :  { %v61_v36 = vadd.f32 %v58_v34, %v58_v34  ;;  %v72_v37 = vmul.f32 %v71_v33, %v58_v34 }
  0x37   :  { %v62_v39 = vmul.f32 %v61_v36, %v58_v34  ;;  %v64_v40 = vmul.f32 %v61_v36, %v60_v35  ;;  %v74_v43 = vadd.f32 %v73_v38, %v72_v37 }
  0x39   :  { %v103_v42 = vadd.f32 -1.0, %v62_v39  ;;  %v67_v45 = vmul.f32 %v64_v40, %v61_v36  ;;  %v89_v57 = vmul.f32 %v88_v51, %v64_v40 }
  0x3b   :  { %v65_v44 = vmul.f32 %v103_v42, %v61_v36  ;;  %v77_v46 = vmul.f32 %v103_v42, %v76_v41  ;;  %v68_v52 = vsub.f32 %v67_v45, %v60_v35 }
  0x3d   :  { %v66_v49 = vsub.f32 %v65_v44, %v58_v34  ;;  %v78_v50 = vadd.f32 %v77_v46, %v74_v43  ;;  %v93_v59 = vmul.f32 %v92_v55, %v68_v52 }
  0x3f   :  { %v81_v53 = vmul.f32 %v80_v47, %v66_v49 }
  0x41   :  { %v82_v56 = vadd.f32 %v81_v53, %v78_v50 }
  0x43   :  { %v86_v58 = vadd.f32 %v85_v54, %v82_v56 }
  0x45   :  { %v90_v60 = vadd.f32 %v89_v57, %v86_v58 }
  0x47   :  { %v94_v61 = vadd.f32 %v93_v59, %v90_v60 }
  0x49   :  { %95 = vst [vmem:[%s152_s2] sm:$0xff] %v94_v61 }
  0x4a   :  { %100 = vsyncpa [#allocation3], 1 }

</bundles_post_ra>
